<compile_context>
chip_gen: v7x
topology: tpu7x:2x2x1
jax: 0.10.0
libtpu: 0.0.40
codegen_flags: <defaults>
</compile_context>

<pallas_src>
import jax
import jax.numpy as jnp
from jax.experimental import pallas as pl
from jax.experimental.pallas import tpu as pltpu


# ----------------------------- kernel factory ------------------------------ #

def _make_kernel(*, block_b, L, C_in, C_out, C_pad, num_groups, has_nin, mm_dtype):
    Bb = block_b
    M = Bb * L
    gsz1 = C_in // num_groups
    gsz2 = C_out // num_groups
    eps = 1e-6
    f32 = jnp.float32

    def kernel(x_ref, temb_ref, vec_ref, seg_ref, *rest):
        # ---- parse optional refs (static layout decided by the wrapper) ----
        idx = 0
        segT_ref = None
        if Bb > 1:
            segT_ref = rest[idx]; idx += 1
        mask1_ref = maskT1_ref = None
        if gsz1 > 1:
            mask1_ref, maskT1_ref = rest[idx], rest[idx + 1]; idx += 2
        mask2_ref = maskT2_ref = None
        if gsz2 > 1:
            mask2_ref, maskT2_ref = rest[idx], rest[idx + 1]; idx += 2
        w1_ref = rest[idx]; idx += 1
        w2_ref = rest[idx]; idx += 1
        out_ref = rest[idx]

        # ---- per-channel parameter slab (single input / single DMA) ----
        vec = vec_ref[...]                                    # (8, Cvec) f32
        gn1_g, gn1_b = vec[0:1, :C_in], vec[1:2, :C_in]
        bias1 = vec[2:3, :2 * C_out] if has_nin else vec[2:3, :C_out]
        gn2_g, gn2_b = vec[3:4, :C_out], vec[4:5, :C_out]
        b2 = vec[5:6, :C_pad]

        seg = seg_ref[...]                                    # (Bb, M) f32, hoisted

        pos = jax.lax.broadcasted_iota(jnp.int32, (M, 1), 0) % L
        is_first = pos == 0                 # first position of a batch element
        is_last = pos == (L - 1)            # last position of a batch element

        def swish(v):
            return v * jax.nn.sigmoid(v)

        def taps(h):
            """k=3 conv taps of h (M, C) f32 -> three (M, C) mm_dtype pieces.

            Shifts use XLU rolls (positive static shifts); boundary rows that
            crossed a batch element are zeroed via is_first/is_last masks.
            """
            h_prev = jnp.where(is_first, 0.0, pltpu.roll(h, 1, axis=0))
            h_next = jnp.where(is_last, 0.0, pltpu.roll(h, M - 1, axis=0))
            return [h_prev.astype(mm_dtype), h.astype(mm_dtype),
                    h_next.astype(mm_dtype)]

        def group_norm(h, gamma, beta, gsz, mask_ref, maskT_ref, extra=None):
            """h (M, C) f32.  Per-(batch, group) stats via MXU matmuls.

            Returns (normalized h, extra broadcast to rows).  When Bb == 1 the
            broadcast is plain numpy-style broadcasting (no tiny-K matmul)."""
            C = h.shape[-1]
            s_ss = jnp.dot(seg, jnp.concatenate([h, h * h], axis=1),
                           preferred_element_type=f32)        # (Bb, 2C)
            s, ss = s_ss[:, :C], s_ss[:, C:]
            if gsz == 1:
                inv_n = 1.0 / float(L)
                mean_c = s * inv_n
                var_c = ss * inv_n - mean_c * mean_c
            else:
                G = C // gsz
                inv_n = 1.0 / float(L * gsz)
                grp = jnp.dot(jnp.concatenate([s, ss], axis=0), mask_ref[...],
                              preferred_element_type=f32)     # (2Bb, G)
                mean_g = grp[:Bb] * inv_n
                var_g = grp[Bb:] * inv_n - mean_g * mean_g
                back = jnp.dot(jnp.concatenate([mean_g, var_g], axis=0),
                               maskT_ref[...],
                               preferred_element_type=f32)    # (2Bb, C)
                mean_c, var_c = back[:Bb], back[Bb:]
            # guard E[x^2]-mean^2 cancellation before rsqrt.
            inv_c = jax.lax.rsqrt(jnp.maximum(var_c, 0.0) + eps)   # (Bb, C)
            scale_b = inv_c * gamma
            shift_b = beta - mean_c * scale_b
            if Bb == 1:
                # one batch element per block: plain broadcasting is free.
                return h * scale_b + shift_b, extra
            cat = [scale_b, shift_b] + ([extra] if extra is not None else [])
            rowp = jnp.dot(segT_ref[...], jnp.concatenate(cat, axis=1),
                           preferred_element_type=f32)        # (M, 2C[+Ce])
            hn = h * rowp[:, :C] + rowp[:, C:2 * C]
            extra_rows = rowp[:, 2 * C:] if extra is not None else None
            return hn, extra_rows

        # ---------------- forward pass (mirrors the PyTorch module) --------
        x = x_ref[...]                                        # (M, C_in) f32
        temb_blk = temb_ref[...]                              # (Bb, C_out) f32

        g1, temb_rows = group_norm(x, gn1_g, gn1_b, gsz1, mask1_ref, maskT1_ref,
                                   extra=temb_blk)
        g1 = swish(g1)

        if has_nin:
            # fused conv1 (k=3) + nin (1x1) block-diagonal matmul, 2*C_out wide.
            fused_in = jnp.concatenate(taps(g1) + [x.astype(mm_dtype)], axis=1)
            y_both = jnp.dot(fused_in, w1_ref[...],
                             preferred_element_type=f32) + bias1   # (M, 2*C_out)
            h = y_both[:, :C_out]
        else:
            taps1 = jnp.concatenate(taps(g1), axis=1)              # (M, 3*C_in)
            h = jnp.dot(taps1, w1_ref[...],
                        preferred_element_type=f32) + bias1        # (M, C_out)

        h = h + temb_rows                                          # temb_proj hoisted

        h, _ = group_norm(h, gn2_g, gn2_b, gsz2, mask2_ref, maskT2_ref)
        h = swish(h)
        # dropout(p=0.1) is the identity at inference time.
        taps2 = jnp.concatenate(taps(h), axis=1)                   # (M, 3*C_out)
        h2 = jnp.dot(taps2, w2_ref[...],
                     preferred_element_type=f32) + b2              # (M, C_pad)

        # ---- lane-dense output store (padding lanes sliced off by wrapper) ----
        if has_nin:
            if C_pad == 2 * C_out:
                # lane-roll the fused conv1|nin result so the nin shortcut lands on
                # lanes [0, C_out); padding lanes carry finite junk (h1 values).
                out_ref[...] = h2 + pltpu.roll(y_both, C_out, axis=1)
            else:
                sc = y_both[:, C_out:]
                if C_pad == C_out:
                    out_ref[...] = h2 + sc
                else:
                    out_ref[...] = h2 + jnp.concatenate(
                        [sc, jnp.zeros((M, C_pad - C_out), f32)], axis=1)
        else:
            if C_pad == C_out:
                out_ref[...] = h2 + x
            else:
                out_ref[...] = h2 + jnp.concatenate(
                    [x, jnp.zeros((M, C_pad - C_out), f32)], axis=1)

    return kernel


# --------------------------------- wrapper --------------------------------- #

def resnet_block_nlc(x_nlc, temb, params, *, num_groups=32, block_b=None,
                     mm_dtype=jnp.bfloat16):
    """x_nlc: (B, L, C_in) f32, temb: (B, T) f32 -> (B, L, C_out) f32.

    conv weights are stored as (3, C_in, C_out); to load PyTorch Conv1d weights
    use  w_jax[k, ci, co] = w_torch[co, ci, k].
    """
    x_nlc = jnp.asarray(x_nlc, jnp.float32)
    temb = jnp.asarray(temb, jnp.float32)
    B, L, C_in = x_nlc.shape
    C_out = params["conv1_w"].shape[-1]
    G = num_groups
    assert C_in % G == 0 and C_out % G == 0, "GroupNorm(32) needs C % 32 == 0"

    if block_b is None:
        # Prefer >= 2 grid steps when B >= 2 (v7x: 2 TensorCores share the
        # "parallel" grid axis), while keeping blocks large enough to amortize
        # the ~0.35us per-step overhead (raise target_rows on v5e/v6e if the
        # 128 MiB VMEM allows; halve it for v7x's 64 MiB).
        target_rows = 2048
        block_b = B
        for d in sorted((d for d in range(1, B) if B % d == 0), reverse=True):
            if d * L <= target_rows and (d * L) % 8 == 0:
                block_b = d
                break
    assert B % block_b == 0
    nb = B // block_b
    Bb = block_b
    M = Bb * L
    if nb > 1:
        assert M % 8 == 0, "block rows must be a multiple of 8 when tiling B"

    has_nin = (C_in != C_out)
    gsz1 = C_in // G
    gsz2 = C_out // G
    # pad narrow outputs to a full 128-lane (unmasked) store; sliced off below.
    C_pad = 128 if C_out < 128 else C_out
    # TODO(synk): use_conv_shortcut=True (3x3 shortcut conv) variant not
    # implemented; module default uses the 1x1 nin_shortcut, handled here.

    # ---- hoisted (XLA-side) pieces ----
    # temb_proj(swish(temb)) once per batch element -> (B, C_out); rows are
    # broadcast inside the kernel (no (B*L, C_out) HBM expansion).
    t = temb * jax.nn.sigmoid(temb)
    temb_c = (t @ params["temb_w"].astype(jnp.float32)
              + params["temb_b"]).astype(jnp.float32)
    temb3 = temb_c.reshape(nb, Bb, C_out)

    # flatten NLC -> rows; channels stay on the lane axis.
    x2 = x_nlc.reshape(B * L, C_in)

    # conv weights: taps pre-stacked; conv1 fused block-diagonally with nin.
    w1flat = params["conv1_w"].reshape(3 * C_in, C_out).astype(jnp.float32)
    if has_nin:
        nin_w = jnp.asarray(params["nin_w"], jnp.float32)
        w1s = jnp.concatenate([
            jnp.concatenate([w1flat, jnp.zeros((3 * C_in, C_out), jnp.float32)], axis=1),
            jnp.concatenate([jnp.zeros((C_in, C_out), jnp.float32), nin_w], axis=1),
        ], axis=0).astype(mm_dtype)                          # (4*C_in, 2*C_out)
    else:
        w1s = w1flat.astype(mm_dtype)                        # (3*C_in, C_out)
    w2flat = params["conv2_w"].reshape(3 * C_out, C_out).astype(jnp.float32)
    w2s = jnp.pad(w2flat, ((0, 0), (0, C_pad - C_out))).astype(mm_dtype)

    # all per-channel vectors in one padded slab -> one input, one DMA.
    Cvec = max(C_in, C_pad, 2 * C_out if has_nin else C_out)

    def _row(v):
        v = jnp.asarray(v, jnp.float32).reshape(-1)
        return jnp.pad(v, (0, Cvec - v.shape[0]))

    if has_nin:
        nin_b = jnp.asarray(params.get("nin_b", jnp.zeros((C_out,), jnp.float32)),
                            jnp.float32).reshape(-1)
        bias1 = jnp.concatenate(
            [jnp.asarray(params["conv1_b"], jnp.float32).reshape(-1), nin_b])
    else:
        bias1 = params["conv1_b"]
    vec = jnp.stack([
        _row(params["gn1_g"]), _row(params["gn1_b"]),
        _row(bias1),
        _row(params["gn2_g"]), _row(params["gn2_b"]),
        _row(params["conv2_b"]),
        jnp.zeros((Cvec,), jnp.float32), jnp.zeros((Cvec,), jnp.float32),
    ])                                                       # (8, Cvec)

    # hoisted batch-segment / group one-hot matrices (DMA'd once, resident).
    rows = jnp.arange(M, dtype=jnp.int32) // L
    seg = (rows[None, :] == jnp.arange(Bb, dtype=jnp.int32)[:, None]
           ).astype(jnp.float32)                             # (Bb, M)

    args = [x2, temb3, vec, seg]
    in_specs = [
        pl.BlockSpec((M, C_in), lambda b: (b, 0)),           # x rows
        pl.BlockSpec((None, Bb, C_out), lambda b: (b, 0, 0)),  # temb per block
        pl.BlockSpec((8, Cvec), lambda b: (0, 0)),           # param slab
        pl.BlockSpec((Bb, M), lambda b: (0, 0)),             # batch segments
    ]
    if Bb > 1:
        args.append(seg.T)                                   # (M, Bb)
        in_specs.append(pl.BlockSpec((M, Bb), lambda b: (0, 0)))

    def _group_masks(C, gsz):
        Gg = C // gsz
        ch = jnp.arange(C, dtype=jnp.int32) // gsz
        m = (ch[:, None] == jnp.arange(Gg, dtype=jnp.int32)[None, :]
             ).astype(jnp.float32)
        return m, m.T

    if gsz1 > 1:
        m1, m1T = _group_masks(C_in, gsz1)
        args += [m1, m1T]
        in_specs += [pl.BlockSpec((C_in, C_in // gsz1), lambda b: (0, 0)),
                     pl.BlockSpec((C_in // gsz1, C_in), lambda b: (0, 0))]
    if gsz2 > 1:
        m2, m2T = _group_masks(C_out, gsz2)
        args += [m2, m2T]
        in_specs += [pl.BlockSpec((C_out, C_out // gsz2), lambda b: (0, 0)),
                     pl.BlockSpec((C_out // gsz2, C_out), lambda b: (0, 0))]

    args += [w1s, w2s]
    in_specs += [pl.BlockSpec(w1s.shape, lambda b: (0, 0)),
                 pl.BlockSpec(w2s.shape, lambda b: (0, 0))]

    kernel = _make_kernel(block_b=Bb, L=L, C_in=C_in, C_out=C_out, C_pad=C_pad,
                          num_groups=G, has_nin=has_nin, mm_dtype=mm_dtype)

    # rough per-step VMEM footprint -> explicit scoped limit (v7x: 64 MiB phys).
    per_step = (2 * M * (C_in + C_pad) * 4                   # double-buffered x + out
                + 8 * M * max(C_in, C_pad) * 4               # live f32 intermediates
                + (w1s.size + w2s.size) * 2)                 # bf16 weights
    vmem_limit = int(min(64 * 1024 * 1024, max(32 * 1024 * 1024, 2 * per_step)))

    out2 = pl.pallas_call(
        kernel,
        out_shape=jax.ShapeDtypeStruct((B * L, C_pad), jnp.float32),
        grid=(nb,),
        in_specs=in_specs,
        out_specs=pl.BlockSpec((M, C_pad), lambda b: (b, 0)),
        compiler_params=pltpu.CompilerParams(
            dimension_semantics=("parallel",),               # independent batch blocks
            vmem_limit_bytes=vmem_limit),
    )(*args)
    if C_pad != C_out:
        out2 = out2[:, :C_out]
    return out2.reshape(B, L, C_out)


def resnet_block_ncl(x_ncl, temb, params, **kw):
    """PyTorch-layout wrapper: (B, C_in, L) -> (B, C_out, L).

    For chains of blocks prefer resnet_block_nlc to avoid boundary transposes.
    """
    out_nlc = resnet_block_nlc(jnp.transpose(x_ncl, (0, 2, 1)), temb, params, **kw)
    return jnp.transpose(out_nlc, (0, 2, 1))


# ---------------------------- pure-JAX reference --------------------------- #

def _ref_forward_ncl(x_ncl, temb, params, num_groups=32, mm_dtype=jnp.bfloat16):
    f32 = jnp.float32
    x = jnp.transpose(jnp.asarray(x_ncl, f32), (0, 2, 1))     # (B, L, C_in)
    B, L, C_in = x.shape
    C_out = params["conv1_w"].shape[-1]
    eps = 1e-6

    def swish(v):
        return v * jax.nn.sigmoid(v)

    def gn(h, gamma, beta):
        Bh, Lh, C = h.shape
        G = num_groups
        hg = h.reshape(Bh, Lh, G, C // G)
        mean = hg.mean(axis=(1, 3), keepdims=True)
        var = hg.var(axis=(1, 3), keepdims=True)
        hn = ((hg - mean) / jnp.sqrt(var + eps)).reshape(Bh, Lh, C)
        return hn * gamma.reshape(1, 1, C) + beta.reshape(1, 1, C)

    def conv3(h, w, b):
        Lh = h.shape[1]
        hp = jnp.pad(h, ((0, 0), (1, 1), (0, 0))).astype(mm_dtype)
        w = w.astype(mm_dtype)
        y = sum(jnp.einsum("blc,cd->bld", hp[:, k:k + Lh, :], w[k],
                           preferred_element_type=f32) for k in range(3))
        return y + b.reshape(1, 1, -1)

    h = swish(gn(x, params["gn1_g"], params["gn1_b"]))
    h = conv3(h, params["conv1_w"], params["conv1_b"])
    t = swish(temb.astype(f32)) @ params["temb_w"] + params["temb_b"]
    h = h + t[:, None, :]
    h = swish(gn(h, params["gn2_g"], params["gn2_b"]))
    h = conv3(h, params["conv2_w"], params["conv2_b"])
    if C_in != C_out:
        sc = jnp.einsum("blc,cd->bld", x.astype(mm_dtype),
                        params["nin_w"].astype(mm_dtype),
                        preferred_element_type=f32) + params["nin_b"].reshape(1, 1, -1)
    else:
        sc = x
    return jnp.transpose(sc + h, (0, 2, 1))


# ----------------------------------- main ----------------------------------- #

if __name__ == "__main__":
    # Small shapes consistent with the module (GroupNorm(32) => C % 32 == 0).
    B, C_in, C_out, L, T = 2, 32, 64, 16, 64
    G = 32

    key = jax.random.PRNGKey(0)
    ks = jax.random.split(key, 12)

    params = {
        "gn1_g": jnp.ones((C_in,), jnp.float32),
        "gn1_b": jnp.zeros((C_in,), jnp.float32),
        # conv weights as (K=3, C_in, C_out): w_jax[k, ci, co] = w_torch[co, ci, k]
        "conv1_w": 0.1 * jax.random.normal(ks[0], (3, C_in, C_out), jnp.float32),
        "conv1_b": 0.1 * jax.random.normal(ks[1], (C_out,), jnp.float32),
        "temb_w": 0.1 * jax.random.normal(ks[2], (T, C_out), jnp.float32),
        "temb_b": 0.1 * jax.random.normal(ks[3], (C_out,), jnp.float32),
        "gn2_g": 1.0 + 0.1 * jax.random.normal(ks[4], (C_out,), jnp.float32),
        "gn2_b": 0.1 * jax.random.normal(ks[5], (C_out,), jnp.float32),
        "conv2_w": 0.1 * jax.random.normal(ks[6], (3, C_out, C_out), jnp.float32),
        "conv2_b": 0.1 * jax.random.normal(ks[7], (C_out,), jnp.float32),
        "nin_w": 0.1 * jax.random.normal(ks[8], (C_in, C_out), jnp.float32),
        "nin_b": 0.1 * jax.random.normal(ks[9], (C_out,), jnp.float32),
    }

    x = jax.random.normal(ks[10], (B, C_in, L), jnp.float32)    # NCL like PyTorch
    temb = jax.random.normal(ks[11], (B, T), jnp.float32)

    out = jax.block_until_ready(resnet_block_ncl(x, temb, params))
    ref = jax.block_until_ready(_ref_forward_ncl(x, temb, params, num_groups=G))

    assert out.shape == (B, C_out, L), out.shape
    assert bool(jnp.all(jnp.isfinite(out)))
    err = float(jnp.max(jnp.abs(out - ref)))
    assert err < 2e-2, f"max abs err {err}"
    print("KERNEL_OK")
</pallas_src>

<mosaic_0001>
module attributes {stable_mosaic.version = 11 : i64} {
  func.func @kernel(%arg0: i32, %arg1: memref<16x32xf32, #tpu.memory_space<vmem>>, %arg2: memref<1x1x64xf32, #tpu.memory_space<vmem>>, %arg3: memref<8x128xf32, #tpu.memory_space<vmem>>, %arg4: memref<1x16xf32, #tpu.memory_space<vmem>>, %arg5: memref<64x32xf32, #tpu.memory_space<vmem>>, %arg6: memref<32x64xf32, #tpu.memory_space<vmem>>, %arg7: memref<128x128xbf16, #tpu.memory_space<vmem>>, %arg8: memref<192x128xbf16, #tpu.memory_space<vmem>>, %arg9: memref<16x128xf32, #tpu.memory_space<vmem>>) attributes {dimension_semantics = [#tpu.dimension_semantics<parallel>], iteration_bounds = array<i64: 2>, scalar_prefetch = 0 : i64, scratch_operands = 0 : i64, tpu.core_type = #tpu.core_type<tc>, window_params = [{transform_indices = @transform_0, window_bounds = array<i64: 16, 32>}, {transform_indices = @transform_1, window_bounds = array<i64: 1, 1, 64>}, {pipeline_mode = #tpu.pipeline_mode<synchronous>, transform_indices = @transform_2, window_bounds = array<i64: 8, 128>}, {pipeline_mode = #tpu.pipeline_mode<synchronous>, transform_indices = @transform_3, window_bounds = array<i64: 1, 16>}, {pipeline_mode = #tpu.pipeline_mode<synchronous>, transform_indices = @transform_4, window_bounds = array<i64: 64, 32>}, {pipeline_mode = #tpu.pipeline_mode<synchronous>, transform_indices = @transform_5, window_bounds = array<i64: 32, 64>}, {pipeline_mode = #tpu.pipeline_mode<synchronous>, transform_indices = @transform_6, window_bounds = array<i64: 128, 128>}, {pipeline_mode = #tpu.pipeline_mode<synchronous>, transform_indices = @transform_7, window_bounds = array<i64: 192, 128>}, {transform_indices = @transform_8, window_bounds = array<i64: 16, 128>}]} {
    %c0 = arith.constant 0 : index
    %c0_0 = arith.constant 0 : index
    %0 = vector.load %arg3[%c0, %c0_0] : memref<8x128xf32, #tpu.memory_space<vmem>>, vector<8x128xf32>
    %1 = vector.extract_strided_slice %0 {offsets = [0, 0], sizes = [1, 32], strides = [1, 1]} : vector<8x128xf32> to vector<1x32xf32>
    %2 = vector.extract_strided_slice %0 {offsets = [1, 0], sizes = [1, 32], strides = [1, 1]} : vector<8x128xf32> to vector<1x32xf32>
    %3 = vector.extract_strided_slice %0 {offsets = [2, 0], sizes = [1, 128], strides = [1, 1]} : vector<8x128xf32> to vector<1x128xf32>
    %4 = vector.extract_strided_slice %0 {offsets = [3, 0], sizes = [1, 64], strides = [1, 1]} : vector<8x128xf32> to vector<1x64xf32>
    %5 = vector.extract_strided_slice %0 {offsets = [4, 0], sizes = [1, 64], strides = [1, 1]} : vector<8x128xf32> to vector<1x64xf32>
    %6 = vector.extract_strided_slice %0 {offsets = [5, 0], sizes = [1, 128], strides = [1, 1]} : vector<8x128xf32> to vector<1x128xf32>
    %c0_1 = arith.constant 0 : index
    %c0_2 = arith.constant 0 : index
    %7 = vector.load %arg4[%c0_1, %c0_2] : memref<1x16xf32, #tpu.memory_space<vmem>>, vector<1x16xf32>
    %8 = tpu.iota {dimensions = array<i32: 0>} : vector<16x1xi32>
    %c16_i32 = arith.constant 16 : i32
    %c0_i32 = arith.constant 0 : i32
    %9 = arith.cmpi eq, %c16_i32, %c0_i32 : i32
    %c1_i32 = arith.constant 1 : i32
    %10 = arith.select %9, %c1_i32, %c16_i32 : i32
    %11 = vector.broadcast %10 : i32 to vector<16x1xi32>
    %12 = arith.remsi %8, %11 : vector<16x1xi32>
    %c0_i32_3 = arith.constant 0 : i32
    %13 = vector.broadcast %c0_i32_3 : i32 to vector<16x1xi32>
    %14 = arith.cmpi ne, %12, %13 : vector<16x1xi32>
    %c0_i32_4 = arith.constant 0 : i32
    %15 = vector.broadcast %c0_i32_4 : i32 to vector<16x1xi32>
    %16 = arith.cmpi slt, %12, %15 : vector<16x1xi32>
    %c0_i32_5 = arith.constant 0 : i32
    %17 = arith.cmpi slt, %10, %c0_i32_5 : i32
    %18 = vector.broadcast %17 : i1 to vector<16x1xi1>
    %19 = vector.broadcast %18 : vector<16x1xi1> to vector<16x1xi1>
    %20 = arith.xori %16, %19 : vector<16x1xi1>
    %21 = arith.andi %20, %14 : vector<16x1xi1>
    %22 = vector.broadcast %10 : i32 to vector<16x1xi32>
    %23 = arith.addi %12, %22 : vector<16x1xi32>
    %24 = arith.select %21, %23, %12 : vector<16x1xi1>, vector<16x1xi32>
    %c0_i32_6 = arith.constant 0 : i32
    %25 = vector.broadcast %c0_i32_6 : i32 to vector<16x1xi32>
    %26 = arith.cmpi eq, %24, %25 : vector<16x1xi32>
    %c15_i32 = arith.constant 15 : i32
    %27 = vector.broadcast %c15_i32 : i32 to vector<16x1xi32>
    %28 = arith.cmpi eq, %24, %27 : vector<16x1xi32>
    %c0_7 = arith.constant 0 : index
    %c0_8 = arith.constant 0 : index
    %29 = vector.load %arg1[%c0_7, %c0_8] : memref<16x32xf32, #tpu.memory_space<vmem>>, vector<16x32xf32>
    %c0_9 = arith.constant 0 : index
    %c0_10 = arith.constant 0 : index
    %c0_11 = arith.constant 0 : index
    %30 = vector.load %arg2[%c0_9, %c0_10, %c0_11] : memref<1x1x64xf32, #tpu.memory_space<vmem>>, vector<1x1x64xf32>
    %31 = vector.shape_cast %30 : vector<1x1x64xf32> to vector<1x64xf32>
    %32 = arith.mulf %29, %29 : vector<16x32xf32>
    %33 = tpu.concatenate %29, %32 in 1 : vector<16x32xf32>, vector<16x32xf32> -> vector<16x64xf32>
    %cst = arith.constant dense<0.000000e+00> : vector<1x64xf32>
    %34 = tpu.matmul %7, %33, %cst {dimension_numbers = #tpu.dot_dimension_numbers<[1], [0], [0], [1], [0, 0, 1, 1], [], []>} : vector<1x16xf32>, vector<16x64xf32>, vector<1x64xf32> -> vector<1x64xf32>
    %35 = vector.extract_strided_slice %34 {offsets = [0, 0], sizes = [1, 32], strides = [1, 1]} : vector<1x64xf32> to vector<1x32xf32>
    %36 = vector.extract_strided_slice %34 {offsets = [0, 32], sizes = [1, 32], strides = [1, 1]} : vector<1x64xf32> to vector<1x32xf32>
    %cst_12 = arith.constant 6.250000e-02 : f32
    %37 = vector.broadcast %cst_12 : f32 to vector<1x32xf32>
    %38 = arith.mulf %35, %37 : vector<1x32xf32>
    %cst_13 = arith.constant 6.250000e-02 : f32
    %39 = vector.broadcast %cst_13 : f32 to vector<1x32xf32>
    %40 = arith.mulf %36, %39 : vector<1x32xf32>
    %41 = arith.mulf %38, %38 : vector<1x32xf32>
    %42 = arith.subf %40, %41 : vector<1x32xf32>
    %cst_14 = arith.constant 0.000000e+00 : f32
    %43 = vector.broadcast %cst_14 : f32 to vector<1x32xf32>
    %44 = arith.maximumf %42, %43 : vector<1x32xf32>
    %cst_15 = arith.constant 9.99999997E-7 : f32
    %45 = vector.broadcast %cst_15 : f32 to vector<1x32xf32>
    %46 = arith.addf %44, %45 : vector<1x32xf32>
    %47 = math.rsqrt %46 : vector<1x32xf32>
    %48 = arith.mulf %47, %1 : vector<1x32xf32>
    %49 = arith.mulf %38, %48 : vector<1x32xf32>
    %50 = arith.subf %2, %49 : vector<1x32xf32>
    %51 = vector.broadcast %48 : vector<1x32xf32> to vector<16x32xf32>
    %52 = arith.mulf %29, %51 : vector<16x32xf32>
    %53 = vector.broadcast %50 : vector<1x32xf32> to vector<16x32xf32>
    %54 = arith.addf %52, %53 : vector<16x32xf32>
    %55 = arith.negf %54 : vector<16x32xf32>
    %56 = math.exp %55 : vector<16x32xf32>
    %cst_16 = arith.constant 1.000000e+00 : f32
    %57 = vector.broadcast %cst_16 : f32 to vector<16x32xf32>
    %58 = arith.addf %57, %56 : vector<16x32xf32>
    %59 = arith.divf %57, %58 : vector<16x32xf32>
    %60 = arith.mulf %54, %59 : vector<16x32xf32>
    %c1_i32_17 = arith.constant 1 : i32
    %61 = tpu.dynamic_rotate %60 by %c1_i32_17 dim 0 : vector<16x32xf32>, i32 -> vector<16x32xf32>
    %cst_18 = arith.constant 0.000000e+00 : f32
    %62 = vector.shape_cast %26 : vector<16x1xi1> to vector<16x1xi1>
    %63 = vector.broadcast %62 : vector<16x1xi1> to vector<16x32xi1>
    %64 = vector.broadcast %cst_18 : f32 to vector<16x32xf32>
    %65 = arith.select %63, %64, %61 : vector<16x32xi1>, vector<16x32xf32>
    %c15_i32_19 = arith.constant 15 : i32
    %66 = tpu.dynamic_rotate %60 by %c15_i32_19 dim 0 : vector<16x32xf32>, i32 -> vector<16x32xf32>
    %cst_20 = arith.constant 0.000000e+00 : f32
    %67 = vector.shape_cast %28 : vector<16x1xi1> to vector<16x1xi1>
    %68 = vector.broadcast %67 : vector<16x1xi1> to vector<16x32xi1>
    %69 = vector.broadcast %cst_20 : f32 to vector<16x32xf32>
    %70 = arith.select %68, %69, %66 : vector<16x32xi1>, vector<16x32xf32>
    %71 = arith.truncf %65 : vector<16x32xf32> to vector<16x32xbf16>
    %72 = arith.truncf %60 : vector<16x32xf32> to vector<16x32xbf16>
    %73 = arith.truncf %70 : vector<16x32xf32> to vector<16x32xbf16>
    %74 = arith.truncf %29 : vector<16x32xf32> to vector<16x32xbf16>
    %75 = tpu.concatenate %71, %72, %73, %74 in 1 : vector<16x32xbf16>, vector<16x32xbf16>, vector<16x32xbf16>, vector<16x32xbf16> -> vector<16x128xbf16>
    %c0_21 = arith.constant 0 : index
    %c0_22 = arith.constant 0 : index
    %76 = vector.load %arg7[%c0_21, %c0_22] : memref<128x128xbf16, #tpu.memory_space<vmem>>, vector<128x128xbf16>
    %cst_23 = arith.constant dense<0.000000e+00> : vector<16x128xf32>
    %77 = tpu.matmul %75, %76, %cst_23 {dimension_numbers = #tpu.dot_dimension_numbers<[1], [0], [0], [1], [0, 0, 1, 1], [], []>} : vector<16x128xbf16>, vector<128x128xbf16>, vector<16x128xf32> -> vector<16x128xf32>
    %78 = vector.broadcast %3 : vector<1x128xf32> to vector<16x128xf32>
    %79 = arith.addf %77, %78 : vector<16x128xf32>
    %80 = vector.extract_strided_slice %79 {offsets = [0, 0], sizes = [16, 64], strides = [1, 1]} : vector<16x128xf32> to vector<16x64xf32>
    %81 = vector.broadcast %31 : vector<1x64xf32> to vector<16x64xf32>
    %82 = arith.addf %80, %81 : vector<16x64xf32>
    %83 = arith.mulf %82, %82 : vector<16x64xf32>
    %84 = tpu.concatenate %82, %83 in 1 : vector<16x64xf32>, vector<16x64xf32> -> vector<16x128xf32>
    %cst_24 = arith.constant dense<0.000000e+00> : vector<1x128xf32>
    %85 = tpu.matmul %7, %84, %cst_24 {dimension_numbers = #tpu.dot_dimension_numbers<[1], [0], [0], [1], [0, 0, 1, 1], [], []>} : vector<1x16xf32>, vector<16x128xf32>, vector<1x128xf32> -> vector<1x128xf32>
    %86 = vector.extract_strided_slice %85 {offsets = [0, 0], sizes = [1, 64], strides = [1, 1]} : vector<1x128xf32> to vector<1x64xf32>
    %87 = vector.extract_strided_slice %85 {offsets = [0, 64], sizes = [1, 64], strides = [1, 1]} : vector<1x128xf32> to vector<1x64xf32>
    %88 = tpu.concatenate %86, %87 in 0 : vector<1x64xf32>, vector<1x64xf32> -> vector<2x64xf32>
    %c0_25 = arith.constant 0 : index
    %c0_26 = arith.constant 0 : index
    %89 = vector.load %arg5[%c0_25, %c0_26] : memref<64x32xf32, #tpu.memory_space<vmem>>, vector<64x32xf32>
    %cst_27 = arith.constant dense<0.000000e+00> : vector<2x32xf32>
    %90 = tpu.matmul %88, %89, %cst_27 {dimension_numbers = #tpu.dot_dimension_numbers<[1], [0], [0], [1], [0, 0, 1, 1], [], []>} : vector<2x64xf32>, vector<64x32xf32>, vector<2x32xf32> -> vector<2x32xf32>
    %91 = vector.extract_strided_slice %90 {offsets = [0, 0], sizes = [1, 32], strides = [1, 1]} : vector<2x32xf32> to vector<1x32xf32>
    %cst_28 = arith.constant 3.125000e-02 : f32
    %92 = vector.broadcast %cst_28 : f32 to vector<1x32xf32>
    %93 = arith.mulf %91, %92 : vector<1x32xf32>
    %94 = vector.extract_strided_slice %90 {offsets = [1, 0], sizes = [1, 32], strides = [1, 1]} : vector<2x32xf32> to vector<1x32xf32>
    %cst_29 = arith.constant 3.125000e-02 : f32
    %95 = vector.broadcast %cst_29 : f32 to vector<1x32xf32>
    %96 = arith.mulf %94, %95 : vector<1x32xf32>
    %97 = arith.mulf %93, %93 : vector<1x32xf32>
    %98 = arith.subf %96, %97 : vector<1x32xf32>
    %99 = tpu.concatenate %93, %98 in 0 : vector<1x32xf32>, vector<1x32xf32> -> vector<2x32xf32>
    %c0_30 = arith.constant 0 : index
    %c0_31 = arith.constant 0 : index
    %100 = vector.load %arg6[%c0_30, %c0_31] : memref<32x64xf32, #tpu.memory_space<vmem>>, vector<32x64xf32>
    %cst_32 = arith.constant dense<0.000000e+00> : vector<2x64xf32>
    %101 = tpu.matmul %99, %100, %cst_32 {dimension_numbers = #tpu.dot_dimension_numbers<[1], [0], [0], [1], [0, 0, 1, 1], [], []>} : vector<2x32xf32>, vector<32x64xf32>, vector<2x64xf32> -> vector<2x64xf32>
    %102 = vector.extract_strided_slice %101 {offsets = [0, 0], sizes = [1, 64], strides = [1, 1]} : vector<2x64xf32> to vector<1x64xf32>
    %103 = vector.extract_strided_slice %101 {offsets = [1, 0], sizes = [1, 64], strides = [1, 1]} : vector<2x64xf32> to vector<1x64xf32>
    %cst_33 = arith.constant 0.000000e+00 : f32
    %104 = vector.broadcast %cst_33 : f32 to vector<1x64xf32>
    %105 = arith.maximumf %103, %104 : vector<1x64xf32>
    %cst_34 = arith.constant 9.99999997E-7 : f32
    %106 = vector.broadcast %cst_34 : f32 to vector<1x64xf32>
    %107 = arith.addf %105, %106 : vector<1x64xf32>
    %108 = math.rsqrt %107 : vector<1x64xf32>
    %109 = arith.mulf %108, %4 : vector<1x64xf32>
    %110 = arith.mulf %102, %109 : vector<1x64xf32>
    %111 = arith.subf %5, %110 : vector<1x64xf32>
    %112 = vector.broadcast %109 : vector<1x64xf32> to vector<16x64xf32>
    %113 = arith.mulf %82, %112 : vector<16x64xf32>
    %114 = vector.broadcast %111 : vector<1x64xf32> to vector<16x64xf32>
    %115 = arith.addf %113, %114 : vector<16x64xf32>
    %116 = arith.negf %115 : vector<16x64xf32>
    %117 = math.exp %116 : vector<16x64xf32>
    %cst_35 = arith.constant 1.000000e+00 : f32
    %118 = vector.broadcast %cst_35 : f32 to vector<16x64xf32>
    %119 = arith.addf %118, %117 : vector<16x64xf32>
    %120 = arith.divf %118, %119 : vector<16x64xf32>
    %121 = arith.mulf %115, %120 : vector<16x64xf32>
    %c1_i32_36 = arith.constant 1 : i32
    %122 = tpu.dynamic_rotate %121 by %c1_i32_36 dim 0 : vector<16x64xf32>, i32 -> vector<16x64xf32>
    %cst_37 = arith.constant 0.000000e+00 : f32
    %123 = vector.shape_cast %26 : vector<16x1xi1> to vector<16x1xi1>
    %124 = vector.broadcast %123 : vector<16x1xi1> to vector<16x64xi1>
    %125 = vector.broadcast %cst_37 : f32 to vector<16x64xf32>
    %126 = arith.select %124, %125, %122 : vector<16x64xi1>, vector<16x64xf32>
    %c15_i32_38 = arith.constant 15 : i32
    %127 = tpu.dynamic_rotate %121 by %c15_i32_38 dim 0 : vector<16x64xf32>, i32 -> vector<16x64xf32>
    %cst_39 = arith.constant 0.000000e+00 : f32
    %128 = vector.shape_cast %28 : vector<16x1xi1> to vector<16x1xi1>
    %129 = vector.broadcast %128 : vector<16x1xi1> to vector<16x64xi1>
    %130 = vector.broadcast %cst_39 : f32 to vector<16x64xf32>
    %131 = arith.select %129, %130, %127 : vector<16x64xi1>, vector<16x64xf32>
    %132 = arith.truncf %126 : vector<16x64xf32> to vector<16x64xbf16>
    %133 = arith.truncf %121 : vector<16x64xf32> to vector<16x64xbf16>
    %134 = arith.truncf %131 : vector<16x64xf32> to vector<16x64xbf16>
    %135 = tpu.concatenate %132, %133, %134 in 1 : vector<16x64xbf16>, vector<16x64xbf16>, vector<16x64xbf16> -> vector<16x192xbf16>
    %c0_40 = arith.constant 0 : index
    %c0_41 = arith.constant 0 : index
    %136 = vector.load %arg8[%c0_40, %c0_41] : memref<192x128xbf16, #tpu.memory_space<vmem>>, vector<192x128xbf16>
    %cst_42 = arith.constant dense<0.000000e+00> : vector<16x128xf32>
    %137 = tpu.matmul %135, %136, %cst_42 {dimension_numbers = #tpu.dot_dimension_numbers<[1], [0], [0], [1], [0, 0, 1, 1], [], []>} : vector<16x192xbf16>, vector<192x128xbf16>, vector<16x128xf32> -> vector<16x128xf32>
    %138 = vector.broadcast %6 : vector<1x128xf32> to vector<16x128xf32>
    %139 = arith.addf %137, %138 : vector<16x128xf32>
    %c64_i32 = arith.constant 64 : i32
    %140 = tpu.dynamic_rotate %79 by %c64_i32 dim 1 : vector<16x128xf32>, i32 -> vector<16x128xf32>
    %141 = arith.addf %139, %140 : vector<16x128xf32>
    %c0_43 = arith.constant 0 : index
    %c0_44 = arith.constant 0 : index
    %142 = vector.load %arg9[%c0_43, %c0_44] : memref<16x128xf32, #tpu.memory_space<vmem>>, vector<16x128xf32>
    tpu.vector_store %arg9[%c0_43, %c0_44], %141 {strides = array<i32>} : memref<16x128xf32, #tpu.memory_space<vmem>>, vector<16x128xf32>,
    return
  }
  func.func @transform_0(%arg0: i32) -> (i32, i32) {
    %c0_i32 = arith.constant 0 : i32
    %c0_i32_0 = arith.constant 0 : i32
    return %arg0, %c0_i32 : i32, i32
  }
  func.func @transform_1(%arg0: i32) -> (i32, i32, i32) {
    %c0_i32 = arith.constant 0 : i32
    %c0_i32_0 = arith.constant 0 : i32
    %c0_i32_1 = arith.constant 0 : i32
    return %arg0, %c0_i32, %c0_i32_0 : i32, i32, i32
  }
  func.func @transform_2(%arg0: i32) -> (i32, i32) {
    %c0_i32 = arith.constant 0 : i32
    %c0_i32_0 = arith.constant 0 : i32
    %c0_i32_1 = arith.constant 0 : i32
    return %c0_i32, %c0_i32_0 : i32, i32
  }
  func.func @transform_3(%arg0: i32) -> (i32, i32) {
    %c0_i32 = arith.constant 0 : i32
    %c0_i32_0 = arith.constant 0 : i32
    %c0_i32_1 = arith.constant 0 : i32
    return %c0_i32, %c0_i32_0 : i32, i32
  }
  func.func @transform_4(%arg0: i32) -> (i32, i32) {
    %c0_i32 = arith.constant 0 : i32
    %c0_i32_0 = arith.constant 0 : i32
    %c0_i32_1 = arith.constant 0 : i32
    return %c0_i32, %c0_i32_0 : i32, i32
  }
  func.func @transform_5(%arg0: i32) -> (i32, i32) {
    %c0_i32 = arith.constant 0 : i32
    %c0_i32_0 = arith.constant 0 : i32
    %c0_i32_1 = arith.constant 0 : i32
    return %c0_i32, %c0_i32_0 : i32, i32
  }
  func.func @transform_6(%arg0: i32) -> (i32, i32) {
    %c0_i32 = arith.constant 0 : i32
    %c0_i32_0 = arith.constant 0 : i32
    %c0_i32_1 = arith.constant 0 : i32
    return %c0_i32, %c0_i32_0 : i32, i32
  }
  func.func @transform_7(%arg0: i32) -> (i32, i32) {
    %c0_i32 = arith.constant 0 : i32
    %c0_i32_0 = arith.constant 0 : i32
    %c0_i32_1 = arith.constant 0 : i32
    return %c0_i32, %c0_i32_0 : i32, i32
  }
  func.func @transform_8(%arg0: i32) -> (i32, i32) {
    %c0_i32 = arith.constant 0 : i32
    %c0_i32_0 = arith.constant 0 : i32
    return %arg0, %c0_i32 : i32, i32
  }
}

</mosaic_0001>

<bundles_post_ra>
// kernel: tpu_custom_call.1
= control target key start
LH: loop header
LB: loop body
LE: loop exit
PB: predicated region body
PF: predicated region fallthrough
CT: control target
= control target key end

     0   :  { %13 = vsyncpa [#allocation3], 0  ;;  %s2266_s0 = inlined_call_operand.hbm [shape: f32[32,32], index: 0, kind: input, shape index: {}]   ;;  %s2267_s1 = inlined_call_operand.vmem [shape: f32[2,1,64], index: 1, kind: input, shape index: {}]   ;;  %s2268_s2 = inlined_call_operand.vmem [shape: f32[8,128], index: 2, kind: input, shape index: {}]   ;;  %s2269_s3 = inlined_call_operand.vmem [shape: f32[1,16], index: 3, kind: input, shape index: {}]   ;;  %s2270_s4 = inlined_call_operand.vmem [shape: f32[64,32], index: 4, kind: input, shape index: {}]   ;;  %s2271_s5 = inlined_call_operand.hbm [shape: f32[32,64], index: 5, kind: input, shape index: {}]   ;;  %s2272_s6 = inlined_call_operand.hbm [shape: bf16[128,128], index: 6, kind: input, shape index: {}]   ;;  %s2273_s7 = inlined_call_operand.vmem [shape: bf16[192,128], index: 7, kind: input, shape index: {}]   ;;  %s2274_s8 = inlined_call_operand.hbm [shape: f32[32,128], index: 8, kind: output, shape index: {}]  }
   0x1   :  { %15 = vsyncpa [#allocation3 + $0x1], 0 }
   0x2   :  { %16 = vsyncpa [#allocation6], 0 }
   0x3   :  { %17 = vsyncpa [#allocation4], 0 }
   0x4   :  { %19 = vsyncpa [#allocation4 + $0x1], 0  ;;  %s1809_s27 = smov 0   ;;  %s1811_s28 = smov 0  }
   0x5   :  { %s1813_s29 = smov 0   ;;  %s1815_s30 = smov 0  }
   0x6 LB: > { %s1830_s9 = sadd.s32 4294967295, %s1745_s30   ;;  %s1292_s10 = sadd.s32 4294967294, %s1745_s30   ;;  %s1745_s30 = sphi %s1815_s30, %s2302_s30   ;;  %s1741_s29 = sphi %s1813_s29, %s2301_s29   ;;  %s1737_s28 = sphi %s1811_s28, %s2300_s28   ;;  %s1733_s27 = sphi %s1809_s27, %s2299_s27  }
   0x7   : > { %p45_p0 = scmp.ne.s32.totalorder %s1737_s28, %s1733_s27  ;;  %p2275_p1 = scmp.eq.s32.totalorder %s1830_s9, 0 }
   0x8   : > { %p227_p3 = scmp.eq.s32.totalorder %s1292_s10, 1  ;;  %p1293_p5 = scmp.ge.s32.totalorder %s1745_s30, 1 }
   0x9   : > { %p1839_p4 = por %p2275_p1, %p45_p0  ;;  %p234_p7 = scmp.lt.s32.totalorder %s1745_s30, 3 }
   0xa   : > { %p1844_p6 = por %p227_p3, %p45_p0  ;;  %s1747_s14 = smov [#allocation5]  }
   0xb   : > { %s2280_s11 = scalar_select %p1839_p4, 1, 0 }
   0xc   : > { %s2281_s12 = scalar_select %p1844_p6, 1, 0 }
   0xd   : > { %p1849_p8 = pnand %p1293_p5, %p234_p7  ;;  %s255_s15 = sshll.u32 %s1747_s14, 4  ;;  %s1853_s15 = int_to_ptr.vmem [resolvable:$true] %s255_s15 }
   0xe   : > { %s1748_s17 = smov [#allocation7]   ;;  %s1589_s21 = scalar_lea.hbm %s2271_s5, 512 }
   0xf   : > { %p1471_p9 = pneg %p1849_p8  ;;  %s268_s18 = sshll.u32 %s1748_s17, 4  ;;  %s1864_s18 = int_to_ptr.vmem [resolvable:$true] %s268_s18 }
  0x10   : > { %p1590_p12 = scmp.ne.s32.totalorder %s2271_s5, %s1589_s21  ;;  %p1596_p5 = scmp.lt.u32.totalorder %s1589_s21, %s2271_s5 }
  0x11   : > { %p1860_p11 = pnand %p1471_p9, %p2275_p1 }
  0x13   : > { %p1591_p13 = pneg %p1860_p11 }
  0x15   : > { %p1592_p0 = pnand %p1591_p13, %p1590_p12 }
  0x17   : > { %p1593_p3 = pneg %p1592_p0 }
  0x19   : > { %p1598_p7 = pnand %p1596_p5, %p1593_p3 }
  0x1b   : > { %1601 = shalt.err (!%p1598_p7)
}
  0x1c   : > { %s1602_s26 = scalar_lea.vmem %s1853_s15, 512  ;;  %p1610_p2 = scmp.lt.s32.totalorder %s1853_s15, %s1853_s15 }
  0x1d   : > { %p1603_p9 = scmp.ne.s32.totalorder %s1853_s15, %s1602_s26  ;;  %p1611_p12 = scmp.lt.s32.totalorder %s1602_s26, %s1602_s26 }
  0x1f   : > { %p1605_p10 = pnand %p1603_p9, %p1591_p13  ;;  %p1612_p0 = por %p1611_p12, %p1610_p2 }
  0x21   : > { %p1606_p1 = pneg %p1605_p10 }
  0x23   : > { %p1613_p6 = pnand %p1612_p0, %p1606_p1 }
  0x25   : > { %1616 = shalt.err (!%p1613_p6)
}
  0x26   : > { %s2276_s10 = smov 128   ;;  %s2277_s14 = smov 8  }
  0x27   : > { %1474 = dma.hbm_to_vmem [thread:$0]  (!%p1860_p11), %s2271_s5, 512, %s1853_s15, [#allocation6], %s2276_s10, %s2276_s10, %s2277_s14  }
  0x28   : > { %s1617_s22 = scalar_lea.hbm %s2272_s6, 1024 }
  0x29   : > { %p1618_p1 = scmp.ne.s32.totalorder %s2272_s6, %s1617_s22  ;;  %p1624_p10 = scmp.lt.u32.totalorder %s1617_s22, %s2272_s6 }
  0x2b   : > { %p1620_p2 = pnand %p1618_p1, %p1591_p13 }
  0x2d   : > { %p1621_p6 = pneg %p1620_p2 }
  0x2f   : > { %p1626_p3 = pnand %p1624_p10, %p1621_p6 }
  0x31   : > { %1629 = shalt.err (!%p1626_p3)
}
  0x32   : > { %s1630_s15 = scalar_lea.vmem %s1864_s18, 1024  ;;  %p1638_p12 = scmp.lt.s32.totalorder %s1864_s18, %s1864_s18 }
  0x33   : > { %p1631_p5 = scmp.ne.s32.totalorder %s1864_s18, %s1630_s15  ;;  %p1639_p0 = scmp.lt.s32.totalorder %s1630_s15, %s1630_s15 }
  0x35   : > { %p1633_p7 = pnand %p1631_p5, %p1591_p13  ;;  %p1640_p1 = por %p1639_p0, %p1638_p12 }
  0x37   : > { %p1634_p9 = pneg %p1633_p7 }
  0x39   : > { %p1641_p2 = pnand %p1640_p1, %p1634_p9 }
  0x3b   : > { %1644 = shalt.err (!%p1641_p2)
}
  0x3c   : > { %s1751_s17 = smov 64   ;;  %s1752_s19 = smov 4  }
  0x3d   : > { %1477 = dma.hbm_to_vmem [thread:$0]  (!%p1860_p11), %s2272_s6, 1024, %s1864_s18, [#allocation6], %s1751_s17, %s1751_s17, %s1752_s19  }
  0x3e   : > { %s1922_s22 = sadd.s32 1, %s1745_s30   ;;  %s32_s24 = sadd.s32 1, %s1741_s29 }
  0x3f   : > { %s29_s23 = ssub.s32 %s1745_s30, %s1922_s22  ;;  %p39_p6 = scmp.ne.s32.totalorder %s1741_s29, %s1737_s28 }
  0x40   : > { %p30_p13 = scmp.eq.s32.totalorder %s29_s23, 0  ;;  %p40_p10 = scmp.eq.s32.totalorder %s1745_s30, 0 }
  0x41   : > { %p2284_p5 = scmp.eq.s32.totalorder %s1830_s9, 1  ;;  %p1488_p9 = scmp.lt.s32.totalorder %s1745_s30, 2 }
  0x42   : > { %s1931_s25 = scalar_select %p30_p13, %s1741_s29, %s32_s24  }
  0x43   : > { %p41_p3 = por %p40_p10, %p39_p6  ;;  %p1935_p7 = por %p2284_p5, %p39_p6 }
  0x44   : > { %s285_s16 = sand.u32 1, %s1741_s29   ;;  %s1340_s18 = sshll.u32 %s1745_s30, 8 }
  0x45   : > { %s2285_s26 = scalar_select %p1935_p7, 1, 0 }
  0x46   : > { %s1297_s15 = sshll.u32 %s285_s16, 4  ;;  %s1945_s20 = scalar_lea.hbm %s2266_s0, %s1340_s18 }
  0x47   : > { %s289_s21 = scalar_lea.vmem [#allocation2], %s1297_s15  ;;  %p1949_p11 = pnand %p1488_p9, %p41_p3 }
  0x48   : > { %s296_s23 = sshll.u32 %s289_s21, 4  ;;  %s1953_s10 = scalar_lea.sflag [#allocation3], %s285_s16  ;;  %s1947_s23 = int_to_ptr.vmem [resolvable:$true] %s296_s23 }
  0x49   : > { %s1645_s14 = scalar_lea.hbm %s1945_s20, 256  ;;  %p1647_p0 = pneg %p1949_p11 }
  0x4a   : > { %p1646_p12 = scmp.ne.s32.totalorder %s1945_s20, %s1645_s14  ;;  %s1650_s17 = scalar_lea.hbm %s2266_s0, 512 }
  0x4b   : > { %p1651_p13 = scmp.lt.u32.totalorder %s1945_s20, %s2266_s0  ;;  %p1652_p6 = scmp.lt.u32.totalorder %s1650_s17, %s1645_s14 }
  0x4c   : > { %p1648_p1 = pnand %p1647_p0, %p1646_p12  ;;  %p1654_p3 = scmp.lt.u32.totalorder %s1645_s14, %s1945_s20 }
  0x4d   : > { %p1653_p10 = por %p1652_p6, %p1651_p13 }
  0x4e   : > { %p1649_p2 = pneg %p1648_p1 }
  0x4f   : > { %p1655_p5 = por %p1654_p3, %p1653_p10 }
  0x51   : > { %p1656_p9 = pnand %p1655_p5, %p1649_p2 }
  0x53   : > { %1659 = shalt.err (!%p1656_p9)
}
  0x54   : > { %s1660_s16 = scalar_lea.vmem %s1947_s23, 256  ;;  %s1753_s15 = smov [#allocation2]  }
  0x55   : > { %p1661_p12 = scmp.ne.s32.totalorder %s1947_s23, %s1660_s16  ;;  %s1665_s18 = sshll.u32 %s1753_s15, 4  ;;  %s1666_s18 = int_to_ptr.vmem [resolvable:$false] %s1665_s18 }
  0x56   : > { %s1667_s19 = scalar_lea.vmem %s1666_s18, 512  ;;  %p1668_p4 = scmp.lt.s32.totalorder %s1947_s23, %s1666_s18 }
  0x57   : > { %p1663_p1 = pnand %p1661_p12, %p1647_p0  ;;  %p1669_p13 = scmp.lt.s32.totalorder %s1667_s19, %s1660_s16 }
  0x59   : > { %p1664_p7 = pneg %p1663_p1  ;;  %p1670_p6 = por %p1669_p13, %p1668_p4 }
  0x5b   : > { %p1671_p10 = pnand %p1670_p6, %p1664_p7 }
  0x5d   : > { %1674 = shalt.err (!%p1671_p10)
}
  0x5e   : > { %s2287_s14 = smov 8   ;;  %s2288_s17 = smov 128  }
  0x5f   : > { %1481 = dma.hbm_to_vmem [thread:$0]  (!%p1949_p11), %s1945_s20, 256, %s1947_s23, %s1953_s10, %s2288_s17, %s2288_s17, %s2287_s14  }
  0x60   : > { %314 = sbr.rel (%p1849_p8) target bundleno = 2379 (0x94b), region = 52  ;;  %s1987_s21 = sand.u32 (!%p1849_p8), 1, %s1737_s28  }
  0x61   : > { %s1301_s16 = sshll.u32 (!%p1849_p8), %s1987_s21, 4  ;;  %s317_s15 = scalar_lea.sflag (!%p1849_p8), [#allocation3], %s1987_s21 }
  0x62   : > { %s320_s24 = scalar_lea.vmem (!%p1849_p8), [#allocation2], %s1301_s16  ;;  %p2289_p4 = scmp.ne.s32.totalorder (!%p1849_p8), %s2280_s11, 0 }
  0x67   : > { %1720 = dma.done.wait (%p2289_p4), %s317_s15, 256  }
  0x68   : > { %1722 = vsyncadd (%p2289_p4), %s317_s15, 4294967040  ;;  %p2290_p7 = scmp.eq.s32.totalorder %s1830_s9, 0 }
  0x6a   : > { %1724 = dma.done.wait (%p2290_p7), [#allocation6], 1536   ;;  %p2291_p8 = pmov %p2290_p7 }
  0x6b   : > { %v1754_v0 = vmov 0.0|0.0   ;;  %vm1755_vm0 = vmmov 0   ;;  %v1756_v1 = vmov 0.0   ;;  %v2007_v2 = vld [vmem:[%s320_s24] sm:$0xff]  ;;  %v2009_v3 = vld [vmem:[%s320_s24 + $0x8] sm:$0xff]  ;;  %s1757_s11 = smov 32   ;;  %v372_v23 = vlaneseq }
  0x6c   : > { %1726 = vsyncadd (%p2291_p8), [#allocation6], 4294965760  ;;  %1435 = vmatprep.subr.bf16.mxu0 %v1754_v0  ;;  %1375 = vmatprep.mubr.msk.f32.mxu0 %vm1755_vm0, %v1756_v1  ;;  %v406_v4 = vmul.f32 %v2007_v2, %v2007_v2  ;;  %v407_v5 = vmul.f32 %v2009_v3, %v2009_v3  ;;  %vm416_vm1 = vcmask 261120   ;;  %v2023_v13 = vld [vmem:[%s2269_s3] sm:$0x1]  ;;  %vm419_vm2 = vcmask 130048  }
  0x6d   : > { %1378 = vmatprep.subr.bf16.mxu1 %v1756_v1  ;;  %1394 = vmatprep.mubr.msk.bf16.mxu1 %vm1755_vm0, %v1756_v1  ;;  %v2033_v14 = vld [vmem:[%s2268_s2] sm:$0xff]  ;;  %v2038_v24 = vshrl.u32 %v372_v23, 7  ;;  %s1758_s18 = smov 96   ;;  %v1550_v31 = vld [vmem:[#allocation7 + $0x8] sm:$0xff]   ;;  %v1551_v32 = vld [vmem:[#allocation7 + $0x10] sm:$0xff]   ;;  %s1759_s19 = smov 64  }
  0x6e   : > { %v1539_v6 = vpack.i.bf16 %v407_v5, %v406_v4  ;;  %504 = vrot.lane.b32.xlu1 %v2033_v14, %s1757_s11  ;;  %v1549_v30 = vld [vmem:[#allocation7] sm:$0xff]   ;;  %v1552_v33 = vld [vmem:[#allocation7 + $0x18] sm:$0xff]   ;;  %v1554_v35 = vld [vmem:[#allocation7 + $0x28] sm:$0xff]   ;;  %vm585_vm7 = vcmask 523264   ;;  %vm588_vm8 = vcmask 785408   ;;  %p365_p11 = scmp.lt.s32.totalorder %s1830_s9, 1 }
  0x6f   : > { %v519_v26 = vsub.s32 0, %v2038_v24  ;;  %1379 = vmatpush3.bf16.msra.mxu1 %v1549_v30  ;;  %v1553_v34 = vld [vmem:[#allocation7 + $0x20] sm:$0xff]   ;;  %v1555_v36 = vld [vmem:[#allocation7 + $0x30] sm:$0xff]   ;;  %v529_v39 = vsub.s32 1, %v2038_v24  ;;  %v1556_v54 = vld [vmem:[#allocation7 + $0x38] sm:$0xff]   ;;  %v374_v55 = vadd.s32 8, %v2038_v24 }
  0x70   : > { %1540 = vrot.lane.b32.xlu0 %v1539_v6, %s1757_s11  ;;  %1380 = vmatprep.subr.bf16.mxu1 %v1756_v1  ;;  %v379_v58 = vand.u32 15, %v2038_v24  ;;  %vm560_vm3 = vcmp.lt.s32.totalorder %v2038_v24, 7  ;;  %vm549_vm5 = vcmp.lt.s32.totalorder %v2038_v24, 1  ;;  %s366_s14 = scalar_select %p365_p11, %s1830_s9, 1  ;;  %vm796_vm9 = vcmask 1040384  }
  0x71   : > { %v386_v56 = vand.u32 15, %v374_v55  ;;  %v805_v55 = vld [vmem:[%s2270_s4 + $0x38] sm:$0xff]  ;;  %s1341_s10 = sshll.u32 %s1830_s9, 8  ;;  %s1178_s9 = scalar_lea.sflag [#allocation4], %s1987_s21 }
  0x72   : > { %vm2065_vm6 = vcmp.eq.s32.totalorder %v379_v58, 0  ;;  %s367_s24 = scalar_lea.vmem %s2267_s1, %s366_s14  ;;  %p2296_p2 = scmp.ne.s32.totalorder %s2285_s26, 0 }
  0x73   : > { %1381 = vmatpush3.bf16.msra.mxu1 %v1550_v31  ;;  %vm2060_vm4 = vcmp.eq.s32.totalorder %v386_v56, 15 }
  0x74   : > { %1382 = vmatprep.subr.bf16.mxu1 %v1756_v1 }
  0x77   : > { %1383 = vmatpush3.bf16.msra.mxu1 %v1551_v32 }
  0x78   : > { %1384 = vmatprep.subr.bf16.mxu1 %v1756_v1 }
  0x7b   : > { %1385 = vmatpush3.bf16.msra.mxu1 %v1552_v33 }
  0x7c   : > { %1386 = vmatprep.subr.bf16.mxu1 %v1756_v1 }
  0x7f   : > { %1387 = vmatpush3.bf16.msra.mxu1 %v1553_v34 }
  0x80   : > { %1388 = vmatprep.subr.bf16.mxu1 %v1756_v1 }
  0x83   : > { %1389 = vmatpush3.bf16.msra.mxu1 %v1554_v35 }
  0x84   : > { %1390 = vmatprep.subr.bf16.mxu1 %v1756_v1 }
  0x87   : > { %1391 = vmatpush3.bf16.msra.mxu1 %v1555_v36 }
  0x88   : > { %1392 = vmatprep.subr.bf16.mxu1 %v1756_v1 }
  0x8b   : > { %1393 = vmatpush3.bf16.msra.mxu1 %v1556_v54  ;;  %v804_v54 = vld [vmem:[%s2270_s4 + $0x30] sm:$0xff] }
  0x8c   : > { %1441 = vmatprep.subr.bf16.mxu1 %v1754_v0  ;;  %v1451_v56 = vpack.c.bf16 %v805_v55, %v804_v54 }
  0xe0   : > { %v505_v25 = vpop.permute.xlu1 %504 }
  0xe2   : > { %v1541_v7 = vpop.permute.xlu0 %1540 }
  0xe3   : > { %v1543_v8 = vunpack.i.h.bf16 %v1541_v7  ;;  %v1542_v9 = vunpack.i.l.bf16 %v1541_v7 }
  0xe5   : > { %v417_v10 = vsel %vm416_vm1, %v2007_v2, %v1542_v9  ;;  %v418_v11 = vsel %vm416_vm1, %v2009_v3, %v1543_v8  ;;  %v572_v9 = vpack.c.bf16 %v2009_v3, %v2007_v2 }
  0xe6   : > { %v1436_v12 = vpack.c.bf16 %v418_v11, %v417_v10 }
  0xe8   : > { %1437 = vmatpush3.bf16.msra.mxu0 %v1436_v12 }
  0xe9   : > { %1438 = vmatprep.subr.bf16.mxu0 %v1754_v0 }
  0xeb   : > { %1376 = vmatmul.mubr.msk.f32.vlgmr.msra.gmra.mrb[0].mxu0 %vm419_vm2, %v2023_v13 }
  0xec   : > { %1402 = vmatprep.mubr.msk.f32.mxu0 %vm1755_vm0, %v1756_v1 }
 0x1be   : > { %v489_v15 = vpop.f32.mrb[0].mxu0 }
 0x1bf   : > { %v493_v16 = vmul.f32 0.0625, %v489_v15  ;;  %v1377_v17 = vpop.f32.mrb[1].mxu0 }
 0x1c1   : > { %v494_v18 = vmul.f32 %v493_v16, %v493_v16 }
 0x1c3   : > { %496 = vrot.lane.b32.xlu0 %v494_v18, %s1757_s11 }
 0x235   : > { %v497_v19 = vpop.permute.xlu0 %496 }
 0x236   : > { %v499_v20 = vsub.f32 %v493_v16, %v497_v19 }
 0x238   : > { %v500_v21 = vmax.f32 %v499_v20, 0.0 }
 0x23a   : > { %v501_v22 = vadd.f32 1e-06, %v500_v21 }
 0x23c   : > { %1569 = vrsqrt.f32 %v501_v22 }
 0x246   : > { %v1570_v27 = vpop.eup %1569 }
 0x247   : > { %v507_v28 = vmul.f32 %v1570_v27, %v505_v25  ;;  %v610_v25 = vsub.s32 2, %v2038_v24  ;;  %v1316_v27 = vld [vmem:[%s367_s24] ss:$0 sm:$0xff] }
 0x249   : > { %v520_v29 = vrot.slane %v507_v28, %v519_v26  ;;  %509 = vrot.lane.b32.xlu1 %v507_v28, %s1758_s18  ;;  %v611_v26 = vrot.slane %v2033_v14, %v610_v25  ;;  %v1565_v25 = vld [vmem:[%s2273_s7 + $0x40] sm:$0xff]  }
 0x24b   : > { %522 = vrot.lane.b32.xlu0 %v520_v29, %s1758_s18 }
 0x2bb   : > { %v510_v37 = vpop.permute.xlu1 %509 }
 0x2bc   : > { %v512_v38 = vmul.f32 %v510_v37, %v493_v16 }
 0x2bd   : > { %v523_v41 = vpop.permute.xlu0 %522 }
 0x2be   : > { %v514_v40 = vrot.slane %v512_v38, 7  ;;  %v525_v44 = vmul.f32 %v523_v41, %v2007_v2  ;;  %v526_v45 = vmul.f32 %v523_v41, %v2009_v3 }
 0x2c0   : > { %v516_v42 = vsub.f32 %v2033_v14, %v514_v40 }
 0x2c2   : > { %v530_v43 = vrot.slane %v516_v42, %v529_v39 }
 0x2c4   : > { %v531_v46 = vadd.f32 %v530_v43, %v525_v44  ;;  %v532_v47 = vadd.f32 %v530_v43, %v526_v45 }
 0x2c6   : > { %v1306_v48 = vmul.f32 -1.442695, %v531_v46  ;;  %v1307_v49 = vmul.f32 -1.442695, %v532_v47 }
 0x2c8   : > { %1571 = vpow2.f32 %v1306_v48  ;;  %v800_v48 = vld [vmem:[%s2270_s4 + $0x10] sm:$0xff] }
 0x2c9   : > { %1573 = vpow2.f32 %v1307_v49 }
 0x2d2   : > { %v1572_v50 = vpop.eup %1571 }
 0x2d3   : > { %v1574_v51 = vpop.eup %1573  ;;  %v539_v52 = vadd.f32 1.0, %v1572_v50  ;;  %v801_v50 = vld [vmem:[%s2270_s4 + $0x18] sm:$0xff] }
 0x2d4   : > { %v540_v53 = vadd.f32 1.0, %v1574_v51  ;;  %v1445_v51 = vpack.c.bf16 %v801_v50, %v800_v48 }
 0x2d5   : > { %1575 = vrcp.f32 %v539_v52  ;;  %v803_v52 = vld [vmem:[%s2270_s4 + $0x28] sm:$0xff] }
 0x2d6   : > { %1577 = vrcp.f32 %v540_v53 }
 0x2df   : > { %v1576_v57 = vpop.eup %1575 }
 0x2e0   : > { %v1578_v59 = vpop.eup %1577  ;;  %v545_v60 = vmul.f32 %v1576_v57, %v531_v46  ;;  %v798_v46 = vld [vmem:[%s2270_s4] sm:$0xff] }
 0x2e1   : > { %v546_v61 = vmul.f32 %v1578_v59, %v532_v47  ;;  %v799_v47 = vld [vmem:[%s2270_s4 + $0x8] sm:$0xff] }
 0x2e2   : > { %v547_v62 = vrot.slane %v545_v60, 7  ;;  %v558_v4 = vrot.slane %v545_v60, 1  ;;  %v1442_v49 = vpack.c.bf16 %v799_v47, %v798_v46 }
 0x2e3   : > { %v548_v5 = vrot.slane %v546_v61, 7  ;;  %v570_v6 = vpack.c.bf16 %v546_v61, %v545_v60  ;;  %v559_v7 = vrot.slane %v546_v61, 1 }
 0x2e5   : > { %574 = vrot.lane.b32.xlu1 %v570_v6, %s1757_s11  ;;  %v561_v10 = vsel %vm560_vm3, %v558_v4, %v559_v7  ;;  %v562_v11 = vsel %vm560_vm3, %v559_v7, %v558_v4  ;;  %v550_v12 = vsel %vm549_vm5, %v547_v62, %v548_v5  ;;  %v551_v15 = vsel %vm549_vm5, %v548_v5, %v547_v62  ;;  %v886_v62 = vld [vmem:[#allocation5] sm:$0xff]  ;;  %v887_v4 = vld [vmem:[#allocation5 + $0x8] sm:$0xff]  ;;  %v888_v6 = vld [vmem:[#allocation5 + $0x10] sm:$0xff]  ;;  %s363_s11 = scalar_lea.vmem [#allocation8], %s1301_s16  ;;  %s2222_s16 = scalar_lea.hbm %s2274_s8, %s1341_s10 }
 0x2e6   : > { %v568_v16 = vsel %vm2060_vm4, 0.0, %v562_v11  ;;  %v556_v2 = vsel %vm2065_vm6, 0.0, %v551_v15  ;;  %v1454_v5 = vpack.c.bf16 %v887_v4, %v886_v62  ;;  %v889_v7 = vld [vmem:[#allocation5 + $0x18] sm:$0xff]  ;;  %s1191_s13 = sshll.u32 %s363_s11, 4  ;;  %s2217_s13 = int_to_ptr.vmem [resolvable:$true] %s1191_s13 }
 0x2e7   : > { %v571_v3 = vpack.c.bf16 %v568_v16, %v561_v10  ;;  %v569_v17 = vpack.c.bf16 %v550_v12, %v556_v2  ;;  %s1675_s23 = scalar_lea.vmem %s2217_s13, 256 }
 0x2e8   : > { %p1676_p0 = scmp.ne.s32.totalorder %s2217_s13, %s1675_s23 }
 0x2e9   : > { %577 = vrot.lane.b32.xlu0 %v571_v3, %s1759_s19  ;;  %580 = vrot.lane.b32.xlu1 %v572_v9, %s1758_s18  ;;  %v1457_v9 = vpack.c.bf16 %v889_v7, %v888_v6  ;;  %s1761_s18 = smov [#allocation8]  }
 0x2ea   : > { %p1677_p3 = pnand %p1676_p0, %p2296_p2  ;;  %s1679_s14 = sshll.u32 %s1761_s18, 4  ;;  %s1680_s14 = int_to_ptr.vmem [resolvable:$false] %s1679_s14 }
 0x2eb   : > { %s1681_s17 = scalar_lea.vmem %s1680_s14, 512  ;;  %p1682_p9 = scmp.lt.s32.totalorder %s2217_s13, %s1680_s14 }
 0x2ec   : > { %p1678_p5 = pneg %p1677_p3  ;;  %p1683_p12 = scmp.lt.s32.totalorder %s1681_s17, %s1675_s23 }
 0x2ee   : > { %p1684_p1 = por %p1683_p12, %p1682_p9 }
 0x2f0   : > { %p1685_p13 = pnand %p1684_p1, %p1678_p5 }
 0x357   : > { %v575_v18 = vpop.permute.xlu1 %574 }
 0x358   : > { %v584_v19 = vsel %vm416_vm1, %v569_v17, %v575_v18  ;;  %v1760_v17 = vmov 0   ;;  %v1559_v18 = vld [vmem:[%s2273_s7 + $0x10] sm:$0xff]  }
 0x35b   : > { %v578_v20 = vpop.permute.xlu0 %577  ;;  %v581_v21 = vpop.permute.xlu1 %580 }
 0x35c   : > { %v587_v22 = vsel %vm585_vm7, %v584_v19, %v578_v20  ;;  %v1560_v19 = vld [vmem:[%s2273_s7 + $0x18] sm:$0xff]   ;;  %v1561_v20 = vld [vmem:[%s2273_s7 + $0x20] sm:$0xff]  }
 0x35d   : > { %v590_v23 = vsel %vm588_vm8, %v587_v22, %v581_v21  ;;  %v1562_v21 = vld [vmem:[%s2273_s7 + $0x28] sm:$0xff]   ;;  %v1563_v22 = vld [vmem:[%s2273_s7 + $0x30] sm:$0xff]  }
 0x35e   : > { %1395 = vmatmul.mubr.bf16.vlgmr.msra.gmra.mrb[0].mxu1 %v590_v23  ;;  %v1564_v23 = vld [vmem:[%s2273_s7 + $0x38] sm:$0xff]  }
 0x35f   : > { %1421 = vmatprep.mubr.msk.f32.mxu1 %vm1755_vm0, %v1756_v1  ;;  %1443 = vmatpush3.bf16.msra.mxu1 %v1442_v49 }
 0x360   : > { %1444 = vmatprep.subr.bf16.mxu1 %v1754_v0 }
 0x363   : > { %1446 = vmatpush3.bf16.msra.mxu1 %v1445_v51 }
 0x364   : > { %1447 = vmatprep.subr.bf16.mxu1 %v1754_v0 }
 0x431   : > { %v694_v28 = vpop.f32.mrb[0].mxu1 }
 0x432   : > { %v695_v29 = vadd.f32 %v694_v28, %v611_v26  ;;  %v1396_v30 = vpop.f32.mrb[1].mxu1  ;;  %v1568_v28 = vld [vmem:[%s2273_s7 + $0x58] sm:$0xff]  }
 0x433   : > { %v697_v31 = vpop.f32.mrb[2].mxu1 }
 0x434   : > { %v2097_v32 = vadd.f32 %v1316_v27, %v695_v29  ;;  %v2099_v33 = vadd.f32 %v697_v31, %v611_v26  ;;  %v1397_v34 = vpop.f32.mrb[3].mxu1  ;;  %v1566_v26 = vld [vmem:[%s2273_s7 + $0x48] sm:$0xff]  }
 0x436   : > { %v2102_v35 = vadd.f32 %v1316_v27, %v2099_v33  ;;  %v709_v36 = vmul.f32 %v2097_v32, %v2097_v32  ;;  %v1567_v27 = vld [vmem:[%s2273_s7 + $0x50] sm:$0xff]  }
 0x438   : > { %v710_v37 = vmul.f32 %v2102_v35, %v2102_v35 }
 0x43a   : > { %v1544_v38 = vpack.i.bf16 %v710_v37, %v709_v36  ;;  %v966_v36 = vrot.slane %v2033_v14, 2 }
 0x43c   : > { %1545 = vrot.lane.b32.xlu0 %v1544_v38, %s1759_s19 }
 0x4ae   : > { %v1546_v40 = vpop.permute.xlu0 %1545 }
 0x4af   : > { %v1548_v41 = vunpack.i.h.bf16 %v1546_v40  ;;  %v1547_v42 = vunpack.i.l.bf16 %v1546_v40 }
 0x4b1   : > { %v720_v43 = vsel %vm585_vm7, %v2102_v35, %v1548_v41  ;;  %v719_v44 = vsel %vm585_vm7, %v2097_v32, %v1547_v42 }
 0x4b2   : > { %v1439_v45 = vpack.c.bf16 %v720_v43, %v719_v44  ;;  %v985_v44 = vsub.s32 4, %v2038_v24 }
 0x4b4   : > { %1440 = vmatpush3.bf16.msra.mxu0 %v1439_v45 }
 0x4b5   : > { %1128 = vmatprep.subr.bf16.mxu0 %v1760_v17 }
 0x4b7   : > { %1403 = vmatmul.mubr.msk.f32.vlgmr.msra.gmra.mrb[2].mxu0 %vm419_vm2, %v2023_v13  ;;  %v802_v13 = vld [vmem:[%s2270_s4 + $0x20] sm:$0xff] }
 0x4b8   : > { %v1448_v53 = vpack.c.bf16 %v803_v52, %v802_v13 }
 0x4ba   : > { %1449 = vmatpush3.bf16.msra.mxu1 %v1448_v53 }
 0x4bb   : > { %1450 = vmatprep.subr.bf16.mxu1 %v1754_v0 }
 0x4be   : > { %1452 = vmatpush3.bf16.msra.mxu1 %v1451_v56 }
 0x4bf   : > { %1453 = vmatprep.subr.bf16.mxu1 %v1754_v0 }
 0x58a   : > { %v787_v57 = vpop.f32.mrb[2].mxu0 }
 0x58b   : > { %v792_v58 = vrot.slane %v787_v57, 7  ;;  %v1404_v59 = vpop.f32.mrb[3].mxu0 }
 0x58d   : > { %793 = vrot.lane.b32.xlu1 %v792_v58, %s1759_s19 }
 0x591   : > { %1169 = vrot.lane.b32.xlu1 %v695_v29, %s1759_s19 }
 0x5ff   : > { %v794_v60 = vpop.permute.xlu1 %793 }
 0x600   : > { %v797_v61 = vsel %vm796_vm9, %v787_v57, %v794_v60 }
 0x601   : > { %1422 = vmatmul.mubr.msk.f32.vlgmr.msra.gmra.mrb[4].mxu1 %vm585_vm7, %v797_v61 }
 0x602   : > { %1432 = vmatprep.mubr.msk.f32.mxu1 %vm1755_vm0, %v1756_v1  ;;  %1455 = vmatpush3.bf16.msra.mxu1 %v1454_v5  ;;  %v1557_v1 = vld [vmem:[%s2273_s7] sm:$0xff]  }
 0x603   : > { %1456 = vmatprep.subr.bf16.mxu1 %v1754_v0  ;;  %1129 = vmatpush1.bf16.msra.mxu0 %v1557_v1  ;;  %v1558_v0 = vld [vmem:[%s2273_s7 + $0x8] sm:$0xff]  }
 0x604   : > { %1130 = vmatprep.subr.bf16.mxu0 %v1760_v17 }
 0x606   : > { %1458 = vmatpush3.bf16.msra.mxu1 %v1457_v9 }
 0x607   : > { %1131 = vmatpush1.bf16.msra.mxu0 %v1558_v0 }
 0x608   : > { %1132 = vmatprep.subr.bf16.mxu0 %v1760_v17 }
 0x60b   : > { %1133 = vmatpush1.bf16.msra.mxu0 %v1559_v18 }
 0x60c   : > { %1134 = vmatprep.subr.bf16.mxu0 %v1760_v17 }
 0x60f   : > { %1135 = vmatpush1.bf16.msra.mxu0 %v1560_v19 }
 0x610   : > { %1136 = vmatprep.subr.bf16.mxu0 %v1760_v17 }
 0x613   : > { %1137 = vmatpush1.bf16.msra.mxu0 %v1561_v20 }
 0x614   : > { %1138 = vmatprep.subr.bf16.mxu0 %v1760_v17 }
 0x617   : > { %1139 = vmatpush1.bf16.msra.mxu0 %v1562_v21 }
 0x618   : > { %1140 = vmatprep.subr.bf16.mxu0 %v1760_v17 }
 0x61b   : > { %1141 = vmatpush1.bf16.msra.mxu0 %v1563_v22 }
 0x61c   : > { %1142 = vmatprep.subr.bf16.mxu0 %v1760_v17 }
 0x61f   : > { %1143 = vmatpush1.bf16.msra.mxu0 %v1564_v23 }
 0x620   : > { %1144 = vmatprep.subr.bf16.mxu0 %v1760_v17 }
 0x623   : > { %1145 = vmatpush1.bf16.msra.mxu0 %v1565_v25 }
 0x624   : > { %1146 = vmatprep.subr.bf16.mxu0 %v1760_v17 }
 0x627   : > { %1147 = vmatpush1.bf16.msra.mxu0 %v1566_v26 }
 0x628   : > { %1148 = vmatprep.subr.bf16.mxu0 %v1760_v17 }
 0x62b   : > { %1149 = vmatpush1.bf16.msra.mxu0 %v1567_v27 }
 0x62c   : > { %1150 = vmatprep.subr.bf16.mxu0 %v1760_v17 }
 0x62f   : > { %1151 = vmatpush1.bf16.msra.mxu0 %v1568_v28 }
 0x6d4   : > { %v875_v10 = vpop.f32.mrb[4].mxu1 }
 0x6d5   : > { %v879_v11 = vmul.f32 0.03125, %v875_v10  ;;  %v1423_v12 = vpop.f32.mrb[5].mxu1 }
 0x6d7   : > { %v880_v15 = vmul.f32 %v879_v11, %v879_v11 }
 0x6d9   : > { %v882_v16 = vrot.slane %v880_v15, 7 }
 0x6db   : > { %v884_v2 = vsub.f32 %v879_v11, %v882_v16  ;;  %v1051_v16 = vsub.s32 5, %v2038_v24 }
 0x6dd   : > { %v885_v3 = vsel %vm796_vm9, %v879_v11, %v884_v2  ;;  %v1052_v63 = vrot.slane %v2033_v14, %v1051_v16 }
 0x6de   : > { %1433 = vmatmul.mubr.msk.f32.vlgmr.msra.gmra.mrb[6].mxu1 %vm416_vm1, %v885_v3 }
 0x7b1   : > { %v959_v29 = vpop.f32.mrb[6].mxu1 }
 0x7b2   : > { %v963_v30 = vmax.f32 %v959_v29, 0.0  ;;  %v1434_v31 = vpop.f32.mrb[7].mxu1 }
 0x7b4   : > { %v964_v34 = vadd.f32 1e-06, %v963_v30 }
 0x7b6   : > { %1579 = vrsqrt.f32 %v964_v34 }
 0x7c0   : > { %v1580_v37 = vpop.eup %1579 }
 0x7c1   : > { %v968_v38 = vmul.f32 %v1580_v37, %v966_v36 }
 0x7c3   : > { %v970_v40 = vrot.slane %v968_v38, 1  ;;  %v980_v43 = vrot.slane %v968_v38, %v529_v39 }
 0x7c5   : > { %v972_v41 = vmul.f32 %v970_v40, %v959_v29  ;;  %v981_v46 = vmul.f32 %v980_v43, %v2097_v32  ;;  %v982_v47 = vmul.f32 %v980_v43, %v2102_v35 }
 0x7c7   : > { %v974_v42 = vrot.slane %v972_v41, 4 }
 0x7c9   : > { %v976_v45 = vsub.f32 %v2033_v14, %v974_v42 }
 0x7cb   : > { %v986_v48 = vrot.slane %v976_v45, %v985_v44 }
 0x7cd   : > { %v987_v49 = vadd.f32 %v986_v48, %v981_v46  ;;  %v988_v50 = vadd.f32 %v986_v48, %v982_v47 }
 0x7cf   : > { %v1320_v51 = vmul.f32 -1.442695, %v987_v49  ;;  %v1321_v13 = vmul.f32 -1.442695, %v988_v50 }
 0x7d1   : > { %1581 = vpow2.f32 %v1320_v51 }
 0x7d2   : > { %1583 = vpow2.f32 %v1321_v13 }
 0x7db   : > { %v1582_v52 = vpop.eup %1581 }
 0x7dc   : > { %v1584_v53 = vpop.eup %1583  ;;  %v995_v54 = vadd.f32 1.0, %v1582_v52 }
 0x7dd   : > { %v996_v55 = vadd.f32 1.0, %v1584_v53 }
 0x7de   : > { %1585 = vrcp.f32 %v995_v54 }
 0x7df   : > { %1587 = vrcp.f32 %v996_v55 }
 0x7e8   : > { %v1586_v39 = vpop.eup %1585 }
 0x7e9   : > { %v1588_v56 = vpop.eup %1587  ;;  %v1001_v57 = vmul.f32 %v1586_v39, %v987_v49 }
 0x7ea   : > { %v1002_v58 = vmul.f32 %v1588_v56, %v988_v50 }
 0x7eb   : > { %v1009_v32 = vrot.slane %v1001_v57, 1  ;;  %v1003_v59 = vrot.slane %v1001_v57, 7 }
 0x7ec   : > { %v1016_v35 = vpack.c.bf16 %v1002_v58, %v1001_v57  ;;  %v1010_v60 = vrot.slane %v1002_v58, 1  ;;  %v1004_v61 = vrot.slane %v1002_v58, 7 }
 0x7ee   : > { %1019 = vrot.lane.b32.xlu0 %v1016_v35, %s1759_s19  ;;  %v1011_v62 = vsel %vm560_vm3, %v1009_v32, %v1010_v60  ;;  %v1012_v4 = vsel %vm560_vm3, %v1010_v60, %v1009_v32  ;;  %v1005_v5 = vsel %vm549_vm5, %v1003_v59, %v1004_v61  ;;  %v1006_v6 = vsel %vm549_vm5, %v1004_v61, %v1003_v59 }
 0x7ef   : > { %v1014_v7 = vsel %vm2060_vm4, 0.0, %v1012_v4  ;;  %v1007_v9 = vsel %vm2065_vm6, 0.0, %v1006_v6 }
 0x7f0   : > { %v1017_v10 = vpack.c.bf16 %v1014_v7, %v1011_v62  ;;  %v1015_v11 = vpack.c.bf16 %v1005_v5, %v1007_v9 }
 0x7f2   : > { %1171 = vrot.lane.b32.xlu0 %v2099_v33, %s1759_s19  ;;  %1334 = vmatprep.mubr.msk.bf16.mxu0 %vm585_vm7, %v1017_v10  ;;  %v1170_v33 = vpop.permute.xlu1 %1169 }
 0x860   : > { %v1020_v12 = vpop.permute.xlu0 %1019 }
 0x861   : > { %v1023_v15 = vsel %vm585_vm7, %v1015_v11, %v1020_v12 }
 0x862   : > { %1161 = vmatmul.mubr.bf16.vlgmr.msra.gmra.mrb[4].mxu0 %v1023_v15 }
 0x864   : > { %v1172_v14 = vpop.permute.xlu0 %1171 }
 0x935   : > { %v1162_v2 = vpop.f32.mrb[4].mxu0 }
 0x936   : > { %v1163_v8 = vadd.f32 %v1162_v2, %v1052_v63  ;;  %v1164_v3 = vpop.f32.mrb[5].mxu0 }
 0x937   : > { %v1165_v1 = vpop.f32.mrb[6].mxu0 }
 0x938   : > { %v1173_v17 = vadd.f32 %v1170_v33, %v1163_v8  ;;  %v1166_v0 = vadd.f32 %v1165_v1, %v1052_v63  ;;  %v1167_v24 = vpop.f32.mrb[7].mxu0 }
 0x93a   : > { %1175 = vst [vmem:[%s363_s11] sm:$0xff] %v1173_v17  ;;  %v1174_v18 = vadd.f32 %v1172_v14, %v1166_v0 }
 0x93c   : > { %1176 = vst [vmem:[%s363_s11 + $0x8] sm:$0xff] %v1174_v18 }
 0x93d   : > { %1688 = shalt.err (!%p1685_p13)
}
 0x93e   : > { %s1689_s15 = scalar_lea.hbm %s2222_s16, 256  ;;  %s1693_s10 = scalar_lea.hbm %s2274_s8, 512 }
 0x93f   : > { %p1690_p6 = scmp.ne.s32.totalorder %s2222_s16, %s1689_s15  ;;  %p1694_p7 = scmp.lt.u32.totalorder %s2222_s16, %s2274_s8 }
 0x940   : > { %p1695_p8 = scmp.lt.u32.totalorder %s1693_s10, %s1689_s15  ;;  %p1697_p0 = scmp.lt.u32.totalorder %s1689_s15, %s2222_s16 }
 0x941   : > { %p1691_p10 = pnand %p1690_p6, %p2296_p2 }
 0x942   : > { %p1696_p11 = por %p1695_p8, %p1694_p7 }
 0x943   : > { %p1692_p4 = pneg %p1691_p10 }
 0x944   : > { %p1698_p3 = por %p1697_p0, %p1696_p11 }
 0x946   : > { %p1699_p5 = pnand %p1698_p3, %p1692_p4 }
 0x948   : > { %1702 = shalt.err (!%p1699_p5)
}
 0x949   : > { %s1762_s23 = smov 128   ;;  %s1763_s18 = smov 8  }
 0x94a   : > { %1469 = dma.vmem_to_hbm [thread:$0]  (%p2296_p2), %s2217_s13, 256, %s2222_s16, %s1178_s9, %s1762_s23, %s1762_s23, %s1763_s18  }
 0x94b PF: > { %s1206_s14 = sand.u32 1, %s1733_s27   ;;  %p2297_p9 = scmp.ne.s32.totalorder %s2281_s12, 0 }
 0x94c   : > { %p2298_p12 = scmp.ge.s32.totalorder %s1745_s30, 2  ;;  %s1207_s17 = scalar_lea.sflag [#allocation4], %s1206_s14 }
 0x94e   : > { %p1483_p1 = pnand %p2298_p12, %p2297_p9 }
 0x950   : > { %1728 = dma.done.wait (!%p1483_p1), %s1207_s17, 256  }
 0x951   : > { %1730 = vsyncadd (!%p1483_p1), %s1207_s17, 4294967040  ;;  %p22_p13 = scmp.ge.s32.totalorder %s1922_s22, 4   ;;  %s2299_s27 = smov %s1737_s28 }
 0x952   : > { %s2300_s28 = smov %s1741_s29  ;;  %s2301_s29 = smov %s1931_s25 }
 0x953   : > { %s2302_s30 = smov %s1922_s22  ;;  %24 = sbr.rel (!%p22_p13) target bundleno = 6 (0x6), region = 108 }
 0x95a   :  { %1212 = vsyncpa [#allocation3], 1 }
 0x95b   :  { %1214 = vsyncpa [#allocation3 + $0x1], 1 }
 0x95c   :  { %1215 = vsyncpa [#allocation6], 1 }
 0x95d   :  { %1216 = vsyncpa [#allocation4], 1 }
 0x95e   :  { %1218 = vsyncpa [#allocation4 + $0x1], 1 }

</bundles_post_ra>
